<compile_context>
chip_gen: v7x
topology: tpu7x:2x2x1
jax: 0.10.0
libtpu: 0.0.40
codegen_flags: <defaults>
</compile_context>

<pallas_src>
import functools

import jax
import jax.numpy as jnp
from jax.experimental import pallas as pl
from jax.experimental.pallas import tpu as pltpu


def _round_up(x, m):
    return ((x + m - 1) // m) * m


def _cnn_kernel(x_ref, wc_ref, bc_ref, wl_ref, bl_ref, o_ref, *,
                sub_tile, L_out, Lp, num_class):
    # x_ref : (TB*Lp, CE) bf16  im2col'ed embeddings, row = batch*Lp + time
    # wc_ref: (CE, Fp)    bf16  conv weight, im2col layout ([k*E+e, f] = w_conv[f,e,k])
    # bc_ref: (1, Fp)     f32   conv bias
    # wl_ref: (Fp, Cp)    bf16  linear weight, transposed
    # bl_ref: (1, Cp)     f32   linear bias
    # o_ref : (TB, Cp)    f32   log-probs (padded class lanes written as 0)
    TB, Cp = o_ref.shape
    CE = x_ref.shape[1]
    Fp = wc_ref.shape[1]
    num_sub = TB // sub_tile
    rows = sub_tile * Lp

    # Grid-invariant operands: load once, hoisted out of the sub-chunk loop.
    wc = wc_ref[...]
    bc = bc_ref[...]
    wl = wl_ref[...]
    bl = bl_ref[...]

    def body(s, carry):
        # --- conv as a single MXU matmul over this batch sub-chunk (M = sub_tile*Lp) ---
        r0 = pl.multiple_of(s * rows, rows)
        xs = x_ref[pl.ds(r0, rows), :]                                # (SB*Lp, CE) bf16
        conv = jnp.dot(xs, wc, preferred_element_type=jnp.float32)    # (SB*Lp, Fp) f32
        conv = conv.reshape(sub_tile, Lp, Fp)
        if Lp != L_out:  # mask zero-padded time rows so they never win the max-pool
            t = jax.lax.broadcasted_iota(jnp.int32, conv.shape, 1)
            conv = jnp.where(t < L_out, conv, -jnp.inf)

        # --- global max-pool over time; bias + ReLU folded after the pool
        #     (bias is time-invariant, ReLU is monotone => they commute with max) ---
        pooled = jnp.maximum(jnp.max(conv, axis=1) + bc, 0.0)         # (SB, Fp) f32

        # --- Linear (MXU, bf16 operands, f32 accumulate) ---
        logits = jnp.dot(pooled.astype(wl.dtype), wl,
                         preferred_element_type=jnp.float32) + bl     # (SB, Cp) f32

        # --- masked log_softmax over the valid class lanes (output padded to 128) ---
        col = jax.lax.broadcasted_iota(jnp.int32, logits.shape, 1)
        valid = col < num_class
        masked = jnp.where(valid, logits, -jnp.inf)
        m = jnp.max(masked, axis=1, keepdims=True)
        shifted = masked - m
        expv = jnp.where(valid, jnp.exp(shifted), 0.0)
        lse = jnp.log(jnp.sum(expv, axis=1, keepdims=True))

        b0 = pl.multiple_of(s * sub_tile, sub_tile)
        o_ref[pl.ds(b0, sub_tile), :] = jnp.where(valid, shifted - lse, 0.0)
        return carry

    jax.lax.fori_loop(0, num_sub, body, 0, unroll=num_sub <= 8)


def cnn_forward(inputs, emb_w, w_conv, b_conv, w_lin, b_lin, *,
                batch_tile=None, sub_tile=None):
    """inputs: (B, S) int32 token ids. Returns (B, num_class) f32 log-probs."""
    B, S = inputs.shape
    E = emb_w.shape[1]
    F_, _, K = w_conv.shape
    C = w_lin.shape[0]
    pad = 1  # Conv1d(padding=1) from the module

    L_out = S + 2 * pad - K + 1
    Lp = _round_up(L_out, 8)          # sublane-aligned time axis (padded rows masked)
    CE = K * E                        # compact im2col contraction (no 128-lane pad on x)
    Fp = _round_up(F_, 128)
    Cp = _round_up(C, 128)

    # Batch tile per grid step: large enough to amortize grid-step overhead, while the
    # "parallel" grid axis still gets >=2 steps for dual-TC sharding on large batches.
    if batch_tile is None:
        batch_tile = min(128, _round_up(B, 8))
    batch_tile = max(8, _round_up(batch_tile, 8))
    Bp = _round_up(B, batch_tile)

    # In-kernel batch sub-chunk: target ~256 matmul rows (M) per MXU pass while keeping
    # the f32 conv output small enough to avoid vreg spills.
    if sub_tile is None:
        sub_tile = _round_up(max(256 // Lp, 1), 8)
    sub_tile = min(max(8, _round_up(sub_tile, 8)), batch_tile)
    while batch_tile % sub_tile:
        sub_tile -= 8

    # --- glue: embedding gather (minimal bytes), bf16 cast, conv padding, im2col ---
    embeds = jnp.take(emb_w, inputs, axis=0).astype(jnp.bfloat16)          # (B, S, E)
    xpad = jnp.pad(embeds, ((0, 0), (pad, pad), (0, 0)))                   # (B, S+2, E)
    cols = jnp.concatenate([xpad[:, k:k + L_out, :] for k in range(K)],
                           axis=-1)                                        # (B, L_out, K*E)
    cols = jnp.pad(cols, ((0, Bp - B), (0, Lp - L_out), (0, 0)))           # batch + time pad
    x2 = cols.reshape(Bp * Lp, CE)                                         # lane-compact 2-D

    wc = jnp.pad(jnp.transpose(w_conv, (2, 1, 0)).reshape(CE, F_),
                 ((0, 0), (0, Fp - F_))).astype(jnp.bfloat16)              # (CE, Fp)
    bc = jnp.pad(b_conv, (0, Fp - F_)).reshape(1, Fp).astype(jnp.float32)  # (1, Fp)
    wl = jnp.pad(w_lin.T, ((0, Fp - F_), (0, Cp - C))).astype(jnp.bfloat16)  # (Fp, Cp)
    bl = jnp.pad(b_lin, (0, Cp - C)).reshape(1, Cp).astype(jnp.float32)    # (1, Cp)

    kernel = functools.partial(_cnn_kernel, sub_tile=sub_tile, L_out=L_out,
                               Lp=Lp, num_class=C)

    flops = 2 * Bp * Lp * CE * Fp + 2 * Bp * Fp * Cp
    bytes_accessed = (x2.size * 2 + wc.size * 2 + wl.size * 2
                      + bc.size * 4 + bl.size * 4 + Bp * Cp * 4)
    cost = pl.CostEstimate(flops=flops, transcendentals=Bp * Cp,
                           bytes_accessed=bytes_accessed)

    out = pl.pallas_call(
        kernel,
        out_shape=jax.ShapeDtypeStruct((Bp, Cp), jnp.float32),
        grid_spec=pltpu.PrefetchScalarGridSpec(
            num_scalar_prefetch=0,
            grid=(Bp // batch_tile,),
            in_specs=[
                pl.BlockSpec((batch_tile * Lp, CE), lambda i: (i, 0)),
                pl.BlockSpec((CE, Fp), lambda i: (0, 0)),
                pl.BlockSpec((1, Fp), lambda i: (0, 0)),
                pl.BlockSpec((Fp, Cp), lambda i: (0, 0)),
                pl.BlockSpec((1, Cp), lambda i: (0, 0)),
            ],
            out_specs=pl.BlockSpec((batch_tile, Cp), lambda i: (i, 0)),
        ),
        compiler_params=pltpu.CompilerParams(dimension_semantics=("parallel",)),
        cost_estimate=cost,
    )(x2, wc, bc, wl, bl)

    return out[:B, :C]


def _reference(inputs, emb_w, w_conv, b_conv, w_lin, b_lin):
    """Pure-JAX f32 reference matching the PyTorch forward."""
    embeds = emb_w[inputs]                                   # (B, S, E)
    x = jnp.pad(embeds, ((0, 0), (1, 1), (0, 0)))            # conv padding=1
    K = w_conv.shape[2]
    L_out = x.shape[1] - K + 1
    conv = sum(jnp.einsum('ble,fe->blf', x[:, k:k + L_out, :], w_conv[:, :, k])
               for k in range(K)) + b_conv
    act = jnp.maximum(conv, 0.0)
    pooled = jnp.max(act, axis=1)
    logits = pooled @ w_lin.T + b_lin
    return jax.nn.log_softmax(logits, axis=1)


if __name__ == "__main__":
    vocab_size, embedding_dim, filter_size, num_filter, num_class = 32, 16, 3, 32, 4
    batch, seq = 2, 8

    key = jax.random.PRNGKey(0)
    k_emb, k_wc, k_bc, k_wl, k_bl, k_in = jax.random.split(key, 6)

    emb_w = jax.random.normal(k_emb, (vocab_size, embedding_dim), jnp.float32)
    w_conv = jax.random.normal(k_wc, (num_filter, embedding_dim, filter_size), jnp.float32) * 0.1
    b_conv = jax.random.normal(k_bc, (num_filter,), jnp.float32) * 0.1
    w_lin = jax.random.normal(k_wl, (num_class, num_filter), jnp.float32) * 0.1
    b_lin = jax.random.normal(k_bl, (num_class,), jnp.float32) * 0.1

    inputs = jax.random.randint(k_in, (batch, seq), 0, vocab_size, jnp.int32)

    log_probs = cnn_forward(inputs, emb_w, w_conv, b_conv, w_lin, b_lin)
    jax.block_until_ready(log_probs)

    assert log_probs.shape == (batch, num_class)
    # rows of exp(log_softmax) must sum to 1
    row_sums = jnp.sum(jnp.exp(log_probs), axis=1)
    assert jnp.allclose(row_sums, 1.0, atol=1e-5), row_sums
    # compare against a pure-JAX f32 reference (tolerance for bf16 matmul operands)
    ref = _reference(inputs, emb_w, w_conv, b_conv, w_lin, b_lin)
    assert jnp.allclose(log_probs, ref, atol=5e-2), jnp.max(jnp.abs(log_probs - ref))

    print("KERNEL_OK")
</pallas_src>

<mosaic_0001>
module attributes {stable_mosaic.version = 11 : i64} {
  func.func @_cnn_kernel(%arg0: i32, %arg1: memref<64x48xbf16, #tpu.memory_space<vmem>>, %arg2: memref<48x128xbf16, #tpu.memory_space<vmem>>, %arg3: memref<1x128xf32, #tpu.memory_space<vmem>>, %arg4: memref<128x128xbf16, #tpu.memory_space<vmem>>, %arg5: memref<1x128xf32, #tpu.memory_space<vmem>>, %arg6: memref<8x128xf32, #tpu.memory_space<vmem>>) attributes {dimension_semantics = [#tpu.dimension_semantics<parallel>], iteration_bounds = array<i64: 1>, scalar_prefetch = 0 : i64, scratch_operands = 0 : i64, tpu.core_type = #tpu.core_type<tc>, window_params = [{transform_indices = @transform_0, window_bounds = array<i64: 64, 48>}, {pipeline_mode = #tpu.pipeline_mode<synchronous>, transform_indices = @transform_1, window_bounds = array<i64: 48, 128>}, {pipeline_mode = #tpu.pipeline_mode<synchronous>, transform_indices = @transform_2, window_bounds = array<i64: 1, 128>}, {pipeline_mode = #tpu.pipeline_mode<synchronous>, transform_indices = @transform_3, window_bounds = array<i64: 128, 128>}, {pipeline_mode = #tpu.pipeline_mode<synchronous>, transform_indices = @transform_4, window_bounds = array<i64: 1, 128>}, {transform_indices = @transform_5, window_bounds = array<i64: 8, 128>}]} {
    %c0 = arith.constant 0 : index
    %c0_0 = arith.constant 0 : index
    %0 = vector.load %arg2[%c0, %c0_0] : memref<48x128xbf16, #tpu.memory_space<vmem>>, vector<48x128xbf16>
    %c0_1 = arith.constant 0 : index
    %c0_2 = arith.constant 0 : index
    %1 = vector.load %arg3[%c0_1, %c0_2] : memref<1x128xf32, #tpu.memory_space<vmem>>, vector<1x128xf32>
    %c0_3 = arith.constant 0 : index
    %c0_4 = arith.constant 0 : index
    %2 = vector.load %arg4[%c0_3, %c0_4] : memref<128x128xbf16, #tpu.memory_space<vmem>>, vector<128x128xbf16>
    %c0_5 = arith.constant 0 : index
    %c0_6 = arith.constant 0 : index
    %3 = vector.load %arg5[%c0_5, %c0_6] : memref<1x128xf32, #tpu.memory_space<vmem>>, vector<1x128xf32>
    %c0_i32 = arith.constant 0 : i32
    %c64_i32 = arith.constant 64 : i32
    %4 = arith.muli %c0_i32, %c64_i32 : i32
    %5 = tpu.assume_multiple %4, 64 : i32
    %6 = arith.index_cast %5 : i32 to index
    %c0_7 = arith.constant 0 : index
    %7 = vector.load %arg1[%6, %c0_7] : memref<64x48xbf16, #tpu.memory_space<vmem>>, vector<64x48xbf16>
    %cst = arith.constant dense<0.000000e+00> : vector<64x128xf32>
    %8 = tpu.matmul %7, %0, %cst {dimension_numbers = #tpu.dot_dimension_numbers<[1], [0], [0], [1], [0, 0, 1, 1], [], []>} : vector<64x48xbf16>, vector<48x128xbf16>, vector<64x128xf32> -> vector<64x128xf32>
    %9 = vector.shape_cast %8 : vector<64x128xf32> to vector<8x8x128xf32>
    %cst_8 = arith.constant dense<0xFF800000> : vector<8x128xf32>
    %10 = vector.multi_reduction <maximumf>, %9, %cst_8 [1] : vector<8x8x128xf32> to vector<8x128xf32>
    %11 = vector.broadcast %1 : vector<1x128xf32> to vector<8x128xf32>
    %12 = arith.addf %10, %11 : vector<8x128xf32>
    %cst_9 = arith.constant 0.000000e+00 : f32
    %13 = vector.broadcast %cst_9 : f32 to vector<8x128xf32>
    %14 = arith.maximumf %12, %13 : vector<8x128xf32>
    %15 = arith.truncf %14 : vector<8x128xf32> to vector<8x128xbf16>
    %cst_10 = arith.constant dense<0.000000e+00> : vector<8x128xf32>
    %16 = tpu.matmul %15, %2, %cst_10 {dimension_numbers = #tpu.dot_dimension_numbers<[1], [0], [0], [1], [0, 0, 1, 1], [], []>} : vector<8x128xbf16>, vector<128x128xbf16>, vector<8x128xf32> -> vector<8x128xf32>
    %17 = vector.broadcast %3 : vector<1x128xf32> to vector<8x128xf32>
    %18 = arith.addf %16, %17 : vector<8x128xf32>
    %19 = tpu.iota {dimensions = array<i32: 1>} : vector<8x128xi32>
    %c4_i32 = arith.constant 4 : i32
    %20 = vector.broadcast %c4_i32 : i32 to vector<8x128xi32>
    %21 = arith.cmpi slt, %19, %20 : vector<8x128xi32>
    %cst_11 = arith.constant 0xFF800000 : f32
    %22 = vector.broadcast %cst_11 : f32 to vector<8x128xf32>
    %23 = arith.select %21, %18, %22 : vector<8x128xi1>, vector<8x128xf32>
    %cst_12 = arith.constant dense<0xFF800000> : vector<8xf32>
    %24 = vector.multi_reduction <maximumf>, %23, %cst_12 [1] : vector<8x128xf32> to vector<8xf32>
    %25 = vector.shape_cast %24 : vector<8xf32> to vector<8x1xf32>
    %26 = vector.broadcast %25 : vector<8x1xf32> to vector<8x128xf32>
    %27 = arith.subf %23, %26 : vector<8x128xf32>
    %28 = math.exp %27 : vector<8x128xf32>
    %cst_13 = arith.constant 0.000000e+00 : f32
    %29 = vector.broadcast %cst_13 : f32 to vector<8x128xf32>
    %30 = arith.select %21, %28, %29 : vector<8x128xi1>, vector<8x128xf32>
    %cst_14 = arith.constant dense<0.000000e+00> : vector<8xf32>
    %31 = vector.multi_reduction <add>, %30, %cst_14 [1] : vector<8x128xf32> to vector<8xf32>
    %32 = vector.shape_cast %31 : vector<8xf32> to vector<8x1xf32>
    %33 = math.log %32 : vector<8x1xf32>
    %c8_i32 = arith.constant 8 : i32
    %34 = arith.muli %c0_i32, %c8_i32 : i32
    %35 = tpu.assume_multiple %34, 8 : i32
    %36 = vector.broadcast %33 : vector<8x1xf32> to vector<8x128xf32>
    %37 = arith.subf %27, %36 : vector<8x128xf32>
    %cst_15 = arith.constant 0.000000e+00 : f32
    %38 = vector.broadcast %cst_15 : f32 to vector<8x128xf32>
    %39 = arith.select %21, %37, %38 : vector<8x128xi1>, vector<8x128xf32>
    %40 = arith.index_cast %35 : i32 to index
    %c0_16 = arith.constant 0 : index
    %41 = vector.load %arg6[%40, %c0_16] : memref<8x128xf32, #tpu.memory_space<vmem>>, vector<8x128xf32>
    tpu.vector_store %arg6[%40, %c0_16], %39 {strides = array<i32>} : memref<8x128xf32, #tpu.memory_space<vmem>>, vector<8x128xf32>,
    %c1_i32 = arith.constant 1 : i32
    return
  }
  func.func @transform_0(%arg0: i32) -> (i32, i32) {
    %c0_i32 = arith.constant 0 : i32
    %c0_i32_0 = arith.constant 0 : i32
    return %arg0, %c0_i32 : i32, i32
  }
  func.func @transform_1(%arg0: i32) -> (i32, i32) {
    %c0_i32 = arith.constant 0 : i32
    %c0_i32_0 = arith.constant 0 : i32
    %c0_i32_1 = arith.constant 0 : i32
    return %c0_i32, %c0_i32_0 : i32, i32
  }
  func.func @transform_2(%arg0: i32) -> (i32, i32) {
    %c0_i32 = arith.constant 0 : i32
    %c0_i32_0 = arith.constant 0 : i32
    %c0_i32_1 = arith.constant 0 : i32
    return %c0_i32, %c0_i32_0 : i32, i32
  }
  func.func @transform_3(%arg0: i32) -> (i32, i32) {
    %c0_i32 = arith.constant 0 : i32
    %c0_i32_0 = arith.constant 0 : i32
    %c0_i32_1 = arith.constant 0 : i32
    return %c0_i32, %c0_i32_0 : i32, i32
  }
  func.func @transform_4(%arg0: i32) -> (i32, i32) {
    %c0_i32 = arith.constant 0 : i32
    %c0_i32_0 = arith.constant 0 : i32
    %c0_i32_1 = arith.constant 0 : i32
    return %c0_i32, %c0_i32_0 : i32, i32
  }
  func.func @transform_5(%arg0: i32) -> (i32, i32) {
    %c0_i32 = arith.constant 0 : i32
    %c0_i32_0 = arith.constant 0 : i32
    return %arg0, %c0_i32 : i32, i32
  }
}

</mosaic_0001>

<bundles_post_ra>
// kernel: tpu_custom_call.1
= control target key start
LH: loop header
LB: loop body
LE: loop exit
PB: predicated region body
PF: predicated region fallthrough
CT: control target
= control target key end

     0   :  { %10 = vsyncpa [#allocation3], 0  ;;  %s676_s0 = inlined_call_operand.vmem [shape: bf16[64,48], index: 0, kind: input, shape index: {}]   ;;  %s677_s1 = inlined_call_operand.hbm [shape: bf16[48,128], index: 1, kind: input, shape index: {}]   ;;  %s678_s2 = inlined_call_operand.vmem [shape: f32[1,128], index: 2, kind: input, shape index: {}]   ;;  %s679_s3 = inlined_call_operand.vmem [shape: bf16[128,128], index: 3, kind: input, shape index: {}]   ;;  %s680_s4 = inlined_call_operand.vmem [shape: f32[1,128], index: 4, kind: input, shape index: {}]   ;;  %s681_s5 = inlined_call_operand.hbm [shape: f32[8,128], index: 5, kind: output, shape index: {}]  }
   0x1   :  { %11 = vsyncpa [#allocation4], 0  ;;  %s571_s18 = smov [#allocation2]   ;;  %s523_s22 = scalar_lea.hbm %s677_s1, 384 }
   0x2   :  { %s19_s19 = sshll.u32 %s571_s18, 4  ;;  %p524_p0 = scmp.ne.s32.totalorder %s677_s1, %s523_s22  ;;  %s20_s19 = int_to_ptr.vmem [resolvable:$true] %s19_s19 }
   0x3   :  { %p527_p1 = scmp.lt.u32.totalorder %s523_s22, %s677_s1 }
   0x5   :  { %p529_p2 = pnand %p527_p1, %p524_p0 }
   0x7   :  { %532 = shalt.err (!%p529_p2)
}
   0x8   :  { %s533_s27 = scalar_lea.vmem %s20_s19, 384  ;;  %p538_p4 = scmp.lt.s32.totalorder %s20_s19, %s20_s19 }
   0x9   :  { %p534_p3 = scmp.ne.s32.totalorder %s20_s19, %s533_s27  ;;  %p539_p5 = scmp.lt.s32.totalorder %s533_s27, %s533_s27 }
   0xb   :  { %p540_p6 = por %p539_p5, %p538_p4 }
   0xd   :  { %p541_p7 = pnand %p540_p6, %p534_p3 }
   0xf   :  { %544 = shalt.err (!%p541_p7)
}
  0x10   :  { %s572_s28 = smov 64   ;;  %s573_s29 = smov 4  }
  0x11   :  { %25 = dma.hbm_to_vmem [thread:$0]  %s677_s1, 384, %s20_s19, [#allocation3], %s572_s28, %s572_s28, %s573_s29  }
  0x12   :  { %567 = dma.done.wait [#allocation3], 384  }
  0x13   :  { %568 = vsyncadd [#allocation3], 4294966912  ;;  %v504_v0 = vld [vmem:[#allocation2] sm:$0xff]   ;;  %v505_v1 = vld [vmem:[#allocation2 + $0x8] sm:$0xff]   ;;  %vm106_vm0 = vcmask 392192   ;;  %v574_v8 = vmov 0.0  }
  0x14   :  { %464 = vmatprep.subr.bf16.mxu0 %v504_v0  ;;  %v507_v2 = vld [vmem:[%s676_s0] sm:$0xff]   ;;  %v506_v3 = vld [vmem:[#allocation2 + $0x10] sm:$0xff]   ;;  %v508_v4 = vld [vmem:[%s676_s0 + $0x8] sm:$0xff]   ;;  %478 = vmatprep.subr.bf16.mxu1 %v574_v8  ;;  %vm575_vm1 = vmmov 0   ;;  %vm285_vm2 = vcmask 1041409   ;;  %vm288_vm3 = vcmask 1042434  }
  0x15   :  { %465 = vmatpush3.bf16.msra.mxu0 %v504_v0  ;;  %470 = vmatprep.mubr.msk.bf16.mxu0 %vm106_vm0, %v507_v2  ;;  %v509_v5 = vld [vmem:[%s676_s0 + $0x10] sm:$0xff]   ;;  %v510_v6 = vld [vmem:[%s676_s0 + $0x18] sm:$0xff]   ;;  %v511_v7 = vld [vmem:[%s679_s3] sm:$0xff]   ;;  %vm291_vm4 = vcmask 1043459   ;;  %vm294_vm5 = vcmask 1044484   ;;  %vm297_vm6 = vcmask 1045509  }
  0x16   :  { %466 = vmatprep.subr.bf16.mxu0 %v505_v1  ;;  %479 = vmatpush3.bf16.msra.mxu1 %v511_v7  ;;  %v512_v9 = vld [vmem:[%s679_s3 + $0x8] sm:$0xff]   ;;  %v513_v10 = vld [vmem:[%s679_s3 + $0x10] sm:$0xff]   ;;  %v514_v11 = vld [vmem:[%s679_s3 + $0x18] sm:$0xff]   ;;  %vm300_vm7 = vcmask 1046534   ;;  %vm303_vm8 = vcmask 1047559  }
  0x17   :  { %480 = vmatprep.subr.bf16.mxu1 %v574_v8  ;;  %v515_v12 = vld [vmem:[%s679_s3 + $0x20] sm:$0xff]   ;;  %v516_v13 = vld [vmem:[%s679_s3 + $0x28] sm:$0xff]   ;;  %v517_v14 = vld [vmem:[%s679_s3 + $0x30] sm:$0xff]   ;;  %494 = vmatprep.mubr.msk.bf16.mxu1 %vm575_vm1, %v574_v8 }
  0x18   :  { %v518_v15 = vld [vmem:[%s679_s3 + $0x38] sm:$0xff]   ;;  %v438_v39 = vld [vmem:[%s678_s2] ss:$0 sm:$0xff] }
  0x19   :  { %467 = vmatpush3.bf16.msra.mxu0 %v505_v1 }
  0x1a   :  { %468 = vmatprep.subr.bf16.mxu0 %v506_v3  ;;  %481 = vmatpush3.bf16.msra.mxu1 %v512_v9 }
  0x1b   :  { %482 = vmatprep.subr.bf16.mxu1 %v574_v8 }
  0x1d   :  { %469 = vmatpush3.bf16.msra.mxu0 %v506_v3 }
  0x1e   :  { %483 = vmatpush3.bf16.msra.mxu1 %v513_v10 }
  0x1f   :  { %484 = vmatprep.subr.bf16.mxu1 %v574_v8 }
  0x20   :  { %471 = vmatmul.mubr.msk.bf16.vlgmr.msra.gmra.mrb[0].mxu0 %vm106_vm0, %v508_v4 }
  0x21   :  { %474 = vmatprep.mubr.msk.bf16.mxu0 %vm106_vm0, %v509_v5 }
  0x22   :  { %485 = vmatpush3.bf16.msra.mxu1 %v514_v11 }
  0x23   :  { %486 = vmatprep.subr.bf16.mxu1 %v574_v8 }
  0x26   :  { %487 = vmatpush3.bf16.msra.mxu1 %v515_v12 }
  0x27   :  { %488 = vmatprep.subr.bf16.mxu1 %v574_v8 }
  0x28   :  { %475 = vmatmul.mubr.msk.bf16.gmra.mrb[4].mxu0 %vm106_vm0, %v510_v6 }
  0x2a   :  { %489 = vmatpush3.bf16.msra.mxu1 %v516_v13 }
  0x2b   :  { %490 = vmatprep.subr.bf16.mxu1 %v574_v8 }
  0x2e   :  { %491 = vmatpush3.bf16.msra.mxu1 %v517_v14 }
  0x2f   :  { %492 = vmatprep.subr.bf16.mxu1 %v574_v8 }
  0x32   :  { %493 = vmatpush3.bf16.msra.mxu1 %v518_v15 }
  0xf3   :  { %v472_v16 = vpop.f32.mrb[0].mxu0 }
  0xf4   :  { %v196_v17 = vrot.slane %v472_v16, 4  ;;  %v153_v18 = vpop.f32.mrb[1].mxu0 }
  0xf5   :  { %v184_v19 = vrot.slane %v153_v18, 4  ;;  %v473_v20 = vpop.f32.mrb[2].mxu0 }
  0xf6   :  { %v197_v21 = vmax.f32 %v472_v16, %v196_v17  ;;  %v202_v22 = vrot.slane %v473_v20, 4  ;;  %v156_v23 = vpop.f32.mrb[3].mxu0 }
  0xf7   :  { %v185_v24 = vmax.f32 %v153_v18, %v184_v19  ;;  %v190_v25 = vrot.slane %v156_v23, 4 }
  0xf8   :  { %v198_v26 = vrot.slane %v197_v21, 2  ;;  %v203_v27 = vmax.f32 %v473_v20, %v202_v22 }
  0xf9   :  { %v186_v28 = vrot.slane %v185_v24, 2  ;;  %v191_v29 = vmax.f32 %v156_v23, %v190_v25 }
  0xfa   :  { %v199_v30 = vmax.f32 %v197_v21, %v198_v26  ;;  %v204_v31 = vrot.slane %v203_v27, 2 }
  0xfb   :  { %v187_v32 = vmax.f32 %v185_v24, %v186_v28  ;;  %v192_v33 = vrot.slane %v191_v29, 2  ;;  %v476_v34 = vpop.f32.mrb[4].mxu0 }
  0xfc   :  { %v200_v35 = vrot.slane %v199_v30, 1  ;;  %v205_v36 = vmax.f32 %v203_v27, %v204_v31  ;;  %v220_v37 = vrot.slane %v476_v34, 4  ;;  %v169_v38 = vpop.f32.mrb[5].mxu0 }
  0xfd   :  { %v188_v40 = vrot.slane %v187_v32, 1  ;;  %v193_v41 = vmax.f32 %v191_v29, %v192_v33  ;;  %v208_v42 = vrot.slane %v169_v38, 4  ;;  %v477_v43 = vpop.f32.mrb[6].mxu0 }
  0xfe   :  { %v201_v44 = vmax.f32 %v199_v30, %v200_v35  ;;  %v206_v45 = vrot.slane %v205_v36, 1  ;;  %v221_v46 = vmax.f32 %v476_v34, %v220_v37  ;;  %v226_v47 = vrot.slane %v477_v43, 4  ;;  %v172_v48 = vpop.f32.mrb[7].mxu0 }
  0xff   :  { %v189_v49 = vmax.f32 %v187_v32, %v188_v40  ;;  %v194_v50 = vrot.slane %v193_v41, 1  ;;  %v209_v51 = vmax.f32 %v169_v38, %v208_v42  ;;  %v214_v52 = vrot.slane %v172_v48, 4 }
 0x100   :  { %v240_v53 = vadd.f32 %v438_v39, %v201_v44  ;;  %v207_v54 = vmax.f32 %v205_v36, %v206_v45  ;;  %v222_v55 = vrot.slane %v221_v46, 2  ;;  %v227_v56 = vmax.f32 %v477_v43, %v226_v47 }
 0x101   :  { %v238_v57 = vadd.f32 %v438_v39, %v189_v49  ;;  %v195_v58 = vmax.f32 %v193_v41, %v194_v50  ;;  %v210_v59 = vrot.slane %v209_v51, 2  ;;  %v215_v60 = vmax.f32 %v172_v48, %v214_v52 }
 0x102   :  { %v248_v61 = vmax.f32 %v240_v53, 0.0  ;;  %v241_v62 = vadd.f32 %v438_v39, %v207_v54  ;;  %v223_v63 = vmax.f32 %v221_v46, %v222_v55  ;;  %v228_v0 = vrot.slane %v227_v56, 2 }
 0x103   :  { %v246_v1 = vmax.f32 %v238_v57, 0.0  ;;  %v239_v2 = vadd.f32 %v438_v39, %v195_v58  ;;  %v211_v3 = vmax.f32 %v209_v51, %v210_v59  ;;  %v216_v4 = vrot.slane %v215_v60, 2  ;;  %v439_v58 = vld [vmem:[%s680_s4] ss:$0 sm:$0xff]  ;;  %s576_s4 = smov [#allocation5]  }
 0x104   :  { %v256_v5 = vpack.c.bf16 %v248_v61, %v248_v61  ;;  %v249_v6 = vmax.f32 %v241_v62, 0.0  ;;  %v224_v7 = vrot.slane %v223_v63, 1  ;;  %v229_v8 = vmax.f32 %v227_v56, %v228_v0  ;;  %s418_s6 = sshll.u32 %s576_s4, 4  ;;  %s419_s6 = int_to_ptr.vmem [resolvable:$true] %s418_s6 }
 0x105   :  { %v247_v9 = vmax.f32 %v239_v2, 0.0  ;;  %v212_v10 = vrot.slane %v211_v3, 1  ;;  %v217_v11 = vmax.f32 %v215_v60, %v216_v4  ;;  %v254_v15 = vpack.c.bf16 %v246_v1, %v246_v1  ;;  %s545_s7 = scalar_lea.vmem %s419_s6, 128  ;;  %p550_p9 = scmp.lt.s32.totalorder %s419_s6, %s419_s6 }
 0x106   :  { %v257_v12 = vpack.c.bf16 %v249_v6, %v249_v6  ;;  %v225_v13 = vmax.f32 %v223_v63, %v224_v7  ;;  %v230_v14 = vrot.slane %v229_v8, 1  ;;  %v278_v19 = vunpack.c.l.b16 %v256_v5  ;;  %p546_p8 = scmp.ne.s32.totalorder %s419_s6, %s545_s7  ;;  %p551_p10 = scmp.lt.s32.totalorder %s545_s7, %s545_s7 }
 0x107   :  { %v255_v16 = vpack.c.bf16 %v247_v9, %v247_v9  ;;  %v213_v17 = vmax.f32 %v211_v3, %v212_v10  ;;  %v218_v18 = vrot.slane %v217_v11, 1  ;;  %v276_v28 = vunpack.c.l.b16 %v254_v15 }
 0x108   :  { %v244_v20 = vadd.f32 %v438_v39, %v225_v13  ;;  %v231_v21 = vmax.f32 %v229_v8, %v230_v14  ;;  %v279_v22 = vunpack.c.l.b16 %v257_v12  ;;  %v287_v32 = vrot.slane %v278_v19, 6  ;;  %p552_p11 = por %p551_p10, %p550_p9 }
 0x109   :  { %v277_v23 = vunpack.c.l.b16 %v255_v16  ;;  %v242_v24 = vadd.f32 %v438_v39, %v213_v17  ;;  %v219_v25 = vmax.f32 %v217_v11, %v218_v18  ;;  %v395_v56 = vlaneseq }
 0x10a   :  { %v252_v26 = vmax.f32 %v244_v20, 0.0  ;;  %v245_v27 = vadd.f32 %v438_v39, %v231_v21  ;;  %v290_v35 = vrot.slane %v279_v22, 5  ;;  %p553_p12 = pnand %p552_p11, %p546_p8 }
 0x10b   :  { %v284_v29 = vrot.slane %v277_v23, 7  ;;  %v250_v30 = vmax.f32 %v242_v24, 0.0  ;;  %v243_v31 = vadd.f32 %v438_v39, %v219_v25  ;;  %v396_v57 = vand.u32 127, %v395_v56 }
 0x10c   :  { %v260_v33 = vpack.c.bf16 %v252_v26, %v252_v26  ;;  %v253_v34 = vmax.f32 %v245_v27, 0.0 }
 0x10d   :  { %v286_v36 = vsel %vm285_vm2, %v284_v29, %v276_v28  ;;  %v258_v37 = vpack.c.bf16 %v250_v30, %v250_v30  ;;  %v251_v38 = vmax.f32 %v243_v31, 0.0  ;;  %vm397_vm9 = vcmp.lt.s32.totalorder %v396_v57, 4 }
 0x10e   :  { %v261_v40 = vpack.c.bf16 %v253_v34, %v253_v34  ;;  %v289_v41 = vsel %vm288_vm3, %v287_v32, %v286_v36  ;;  %v282_v45 = vunpack.c.l.b16 %v260_v33 }
 0x10f   :  { %v280_v42 = vunpack.c.l.b16 %v258_v37  ;;  %v259_v43 = vpack.c.bf16 %v251_v38, %v251_v38  ;;  %v292_v44 = vsel %vm291_vm4, %v290_v35, %v289_v41 }
 0x110   :  { %v283_v48 = vunpack.c.l.b16 %v261_v40  ;;  %v299_v50 = vrot.slane %v282_v45, 2 }
 0x111   :  { %v293_v46 = vrot.slane %v280_v42, 4  ;;  %v281_v47 = vunpack.c.l.b16 %v259_v43 }
 0x112   :  { %v302_v52 = vrot.slane %v283_v48, 1 }
 0x113   :  { %v296_v39 = vrot.slane %v281_v47, 3  ;;  %v295_v49 = vsel %vm294_vm5, %v293_v46, %v292_v44 }
 0x115   :  { %v298_v51 = vsel %vm297_vm6, %v296_v39, %v295_v49 }
 0x116   :  { %v301_v53 = vsel %vm300_vm7, %v299_v50, %v298_v51 }
 0x117   :  { %v304_v54 = vsel %vm303_vm8, %v302_v52, %v301_v53 }
 0x118   :  { %v305_v55 = vpack.c.b16 %v304_v54, %v304_v54 }
 0x11a   :  { %495 = vmatmul.mubr.bf16.vlgmr.msra.gmra.mrb[0].mxu1 %v305_v55 }
 0x1ed   :  { %v389_v59 = vpop.f32.mrb[0].mxu1 }
 0x1ee   :  { %v390_v60 = vadd.f32 %v439_v58, %v389_v59  ;;  %v496_v61 = vpop.f32.mrb[1].mxu1 }
 0x1ef   :  { %v392_v62 = vpop.f32.mrb[2].mxu1 }
 0x1f0   :  { %v497_v63 = vpop.f32.mrb[3].mxu1  ;;  %v398_v0 = vsel %vm397_vm9, %v390_v60, -inf }
 0x1f1   :  { %399 = vmax.xlane.f32.xlu0 %v398_v0 }
 0x27e   :  { %v400_v1 = vpop.xlane.xlu0 %399 }
 0x27f   :  { %v401_v2 = vsub.f32 %v398_v0, %v400_v1 }
 0x281   :  { %v402_v3 = vmul.f32 1.442695, %v401_v2 }
 0x283   :  { %519 = vpow2.f32 %v402_v3 }
 0x28d   :  { %v520_v4 = vpop.eup %519 }
 0x28e   :  { %v404_v5 = vsel %vm397_vm9, %v520_v4, 0.0 }
 0x28f   :  { %405 = vadd.xlane.f32.xlu0 %v404_v5 }
 0x31c   :  { %v406_v6 = vpop.xlane.xlu0 %405 }
 0x31d   :  { %521 = vlog2.f32 %v406_v6 }
 0x327   :  { %v522_v7 = vpop.eup %521 }
 0x328   :  { %v408_v8 = vmul.f32 0.6931472, %v522_v7 }
 0x32a   :  { %v409_v9 = vsub.f32 %v401_v2, %v408_v8 }
 0x32c   :  { %v410_v10 = vsel %vm397_vm9, %v409_v9, 0.0 }
 0x32d   :  { %411 = vst [vmem:[#allocation5] sm:$0xff] %v410_v10 }
 0x32e   :  { %556 = shalt.err (!%p553_p12)
}
 0x32f   :  { %s557_s10 = scalar_lea.hbm %s681_s5, 128 }
 0x330   :  { %p558_p13 = scmp.ne.s32.totalorder %s681_s5, %s557_s10  ;;  %p561_p0 = scmp.lt.u32.totalorder %s557_s10, %s681_s5 }
 0x332   :  { %p563_p1 = pnand %p561_p0, %p558_p13 }
 0x334   :  { %566 = shalt.err (!%p563_p1)
}
 0x335   :  { %421 = dma.vmem_to_hbm [thread:$0]  %s419_s6, 128, %s681_s5, [#allocation4]  }
 0x336   :  { %569 = dma.done.wait [#allocation4], 128  }
 0x337   :  { %570 = vsyncadd [#allocation4], 4294967168 }
 0x338   :  { %425 = vsyncpa [#allocation3], 1 }
 0x339   :  { %426 = vsyncpa [#allocation4], 1 }

</bundles_post_ra>
